<compile_context>
chip_gen: v6e
topology: v6e:2x2x1
jax: 0.10.0
libtpu: 0.0.40
codegen_flags: <defaults>
</compile_context>

<pallas_src>
import jax
import jax.numpy as jnp
from jax.experimental import pallas as pl
from jax.experimental.pallas import tpu as pltpu

SUBLANE = 8                 # f32 sublane width -> batch-tile alignment
VMEM_BUDGET = 24 << 20      # conservative working-set budget (v7x scoped default is 32 MiB)


def _round_up(n, m):
    return (n + m - 1) // m * m


# ---------------------------------------------------------------------------
# Kernels: MXU matmul(s) + fused bias / ReLU / residual-add / LeakyReLU.
# Weight and bias refs use constant index_maps, so they stay VMEM-resident
# across batch tiles; only activation tiles and the output tile stream to HBM.
# ---------------------------------------------------------------------------

def _bb_kernel_shared(x_ref, w1_ref, b1_ref, wd_ref, bd_ref, o_ref):
    """pre_out is None (pre_out == x): one activation DMA feeds both GEMMs."""
    x = x_ref[...]
    z1 = jnp.dot(x, w1_ref[...], preferred_element_type=jnp.float32) + b1_ref[...]
    z2 = jnp.dot(x, wd_ref[...], preferred_element_type=jnp.float32) + bd_ref[...]
    out = jnp.maximum(z1, 0.0) + z2                                   # ReLU(conv1) + identity
    o_ref[...] = jnp.where(out >= 0.0, out, jnp.float32(0.01) * out)  # LeakyReLU(0.01)


def _bb_kernel_two(pre_ref, x_ref, w1_ref, b1_ref, wd_ref, bd_ref, o_ref):
    """General path: pre_out and x are two separate streams; two dots on the
    same batch tile (no block-diagonal RHS, no host-side LHS concat)."""
    z1 = jnp.dot(pre_ref[...], w1_ref[...], preferred_element_type=jnp.float32) + b1_ref[...]
    z2 = jnp.dot(x_ref[...], wd_ref[...], preferred_element_type=jnp.float32) + bd_ref[...]
    out = jnp.maximum(z1, 0.0) + z2
    o_ref[...] = jnp.where(out >= 0.0, out, jnp.float32(0.01) * out)


# ---------------------------------------------------------------------------
# One-time parameter preparation (call once at init, NOT per forward).
# ---------------------------------------------------------------------------

def prepare_basic_block_params(w1, b1, wd, bd, mask_f32, *, matmul_dtype=None):
    """Folds the fixed mask into conv1's weight/bias:
         masked_fill(p, m, 1e-6) @ W1 + b1 == p @ (W1 * (1-m)) + (b1 + 1e-6 * (m @ W1))
    and optionally casts the matmul weights to bf16 (f32 accumulation / bias /
    epilogue are kept inside the kernel).  Weights are stored [in, out]."""
    w1 = w1.astype(jnp.float32)
    keep = (1.0 - mask_f32.reshape(-1, 1)).astype(jnp.float32)         # (input_dim, 1)
    w1_m = w1 * keep
    b1_m = b1.reshape(1, -1).astype(jnp.float32) + 1e-6 * (mask_f32.reshape(1, -1) @ w1)
    wd_f = wd.astype(jnp.float32)
    bd_f = bd.reshape(1, -1).astype(jnp.float32)
    if matmul_dtype is not None:
        w1_m = w1_m.astype(matmul_dtype)
        wd_f = wd_f.astype(matmul_dtype)
    return w1_m, b1_m, wd_f, bd_f


# ---------------------------------------------------------------------------
# Per-call forward.
# ---------------------------------------------------------------------------

def basic_block(x, w1_m, b1_m, wd, bd, pre_out=None, *, block_m=2048):
    """BasicBlock forward using params from prepare_basic_block_params().

    x       : (B, fix_input_dim)
    pre_out : optional (B, input_dim); None -> pre_out = x (single-stream path)
    w1_m    : (input_dim, base_outdim)   mask-folded conv1 weight ([in, out])
    b1_m    : (1, base_outdim)           mask-folded conv1 bias (f32)
    wd      : (fix_input_dim, base_outdim) downsample weight ([in, out])
    bd      : (1, base_outdim)
    """
    mm_dtype = wd.dtype
    x = x.astype(mm_dtype)              # no-op when the caller already cast upstream
    b, kx = x.shape
    fout = wd.shape[1]

    if pre_out is not None:
        pre_out = pre_out.astype(mm_dtype)
        kp = pre_out.shape[1]
    else:
        kp = 0

    # ---- Batch-tile selection ---------------------------------------------
    #  * big tiles amortize the ~0.35 us/grid-step overhead,
    #  * double-buffered activation + f32 output working set stays under
    #    VMEM_BUDGET (safe on v7x's 64 MiB physical / 32 MiB scoped VMEM),
    #  * >= 2 tiles for non-tiny batches so "parallel" feeds both v7x TCs,
    #  * tile derived from the tile COUNT, so worst-case row padding is
    #    bounded by ~8 * num_tiles instead of a whole tile.
    itemsize = jnp.dtype(mm_dtype).itemsize
    row_bytes = 2 * ((kx + kp) * itemsize + fout * 4)
    tm_cap = max(SUBLANE, (VMEM_BUDGET // row_bytes) // SUBLANE * SUBLANE)
    block_m = max(SUBLANE, min(block_m, tm_cap))
    num_tiles = pl.cdiv(b, block_m)
    if b >= 2 * SUBLANE:
        num_tiles = max(num_tiles, 2)
    tm = _round_up(pl.cdiv(b, num_tiles), SUBLANE)
    num_tiles = pl.cdiv(b, tm)
    bp = tm * num_tiles

    if bp != b:
        # TODO(synk): a bounded/masked last-tile store would avoid this pad pass.
        x = jnp.pad(x, ((0, bp - b), (0, 0)))
        if pre_out is not None:
            pre_out = jnp.pad(pre_out, ((0, bp - b), (0, 0)))

    # Weights/biases: constant index_map -> VMEM-resident across batch tiles.
    w_specs = [
        pl.BlockSpec((w1_m.shape[0], fout), lambda i: (0, 0)),
        pl.BlockSpec((1, fout), lambda i: (0, 0)),
        pl.BlockSpec((wd.shape[0], fout), lambda i: (0, 0)),
        pl.BlockSpec((1, fout), lambda i: (0, 0)),
    ]
    # Output last dim == full array dim (no lane padding): no 4x write
    # amplification for small base_outdim and no post-kernel column slice.
    out_spec = pl.BlockSpec((tm, fout), lambda i: (i, 0))
    out_shape = jax.ShapeDtypeStruct((bp, fout), jnp.float32)
    cparams = pltpu.CompilerParams(dimension_semantics=("parallel",))

    if pre_out is None:
        out = pl.pallas_call(
            _bb_kernel_shared,
            out_shape=out_shape,
            grid=(num_tiles,),
            in_specs=[pl.BlockSpec((tm, kx), lambda i: (i, 0))] + w_specs,
            out_specs=out_spec,
            compiler_params=cparams,
        )(x, w1_m, b1_m, wd, bd)
    else:
        out = pl.pallas_call(
            _bb_kernel_two,
            out_shape=out_shape,
            grid=(num_tiles,),
            in_specs=[pl.BlockSpec((tm, kp), lambda i: (i, 0)),
                      pl.BlockSpec((tm, kx), lambda i: (i, 0))] + w_specs,
            out_specs=out_spec,
            compiler_params=cparams,
        )(pre_out, x, w1_m, b1_m, wd, bd)

    return out if bp == b else out[:b]


# ---------------------------------------------------------------------------
# Synthetic params + pure-JAX reference.
# ---------------------------------------------------------------------------

def make_params(key, input_dim, base_outdim, fix_input_dim):
    """Deterministic synthetic parameters (PyTorch Linear-style uniform init)."""
    k1, k2, k3, k4, k5 = jax.random.split(key, 5)
    bound1 = 1.0 / jnp.sqrt(jnp.float32(input_dim))
    boundd = 1.0 / jnp.sqrt(jnp.float32(fix_input_dim))
    # Stored as [in, out] (transposed w.r.t. PyTorch's [out, in]).
    w1 = jax.random.uniform(k1, (input_dim, base_outdim), jnp.float32, -bound1, bound1)
    b1 = jax.random.uniform(k2, (1, base_outdim), jnp.float32, -bound1, bound1)
    wd = jax.random.uniform(k3, (fix_input_dim, base_outdim), jnp.float32, -boundd, boundd)
    bd = jax.random.uniform(k4, (1, base_outdim), jnp.float32, -boundd, boundd)

    # FixedMaskingModule: random 10% of input features are masked (filled with 1e-6).
    num_masked = int(input_dim * 0.1)
    perm = jax.random.permutation(k5, input_dim)
    mask_bool = jnp.zeros((input_dim,), dtype=bool).at[perm[:num_masked]].set(True)
    mask_f32 = mask_bool.astype(jnp.float32).reshape(1, input_dim)
    return w1, b1, wd, bd, mask_f32


def reference(x, pre_out, mask_f32, w1, b1, wd, bd):
    """Pure-JAX reference of the PyTorch forward."""
    pre_m = jnp.where(mask_f32 > 0.0, 1e-6, pre_out)
    h = jnp.maximum(pre_m @ w1 + b1, 0.0)
    identity = x @ wd + bd
    out = h + identity
    return jnp.where(out >= 0.0, out, 0.01 * out)


if __name__ == "__main__":
    # Small shapes implied by the module: x is [batch, fix_input_dim];
    # pre_out defaults to x, so input_dim == fix_input_dim here.
    batch = 8
    input_dim = fix_input_dim = 32
    base_outdim = 32

    key = jax.random.PRNGKey(0)
    kx, kp = jax.random.split(key, 2)
    x = jax.random.normal(kx, (batch, fix_input_dim), jnp.float32)
    w1, b1, wd, bd, mask_f32 = make_params(kp, input_dim, base_outdim, fix_input_dim)

    # One-time parameter prep (mask fold) hoisted out of the forward call.
    params_f32 = prepare_basic_block_params(w1, b1, wd, bd, mask_f32)

    # pre_out=None -> single-activation-stream path.
    out = jax.block_until_ready(basic_block(x, *params_f32, pre_out=None))
    ref = reference(x, x, mask_f32, w1, b1, wd, bd)
    assert out.shape == (batch, base_outdim)
    assert jnp.allclose(out, ref, atol=1e-5, rtol=1e-5), "mismatch vs reference"

    # General (pre_out is not None) two-stream path.
    pre = jax.random.normal(jax.random.PRNGKey(1), (batch, input_dim), jnp.float32)
    out2 = jax.block_until_ready(basic_block(x, *params_f32, pre_out=pre))
    ref2 = reference(x, pre, mask_f32, w1, b1, wd, bd)
    assert jnp.allclose(out2, ref2, atol=1e-5, rtol=1e-5), "mismatch vs reference (pre_out path)"

    # bf16 matmul operands (f32 accumulation/epilogue kept) -- halves activation
    # and weight HBM bytes on v5e/v6e/v7x; looser tolerance is expected.
    params_bf16 = prepare_basic_block_params(w1, b1, wd, bd, mask_f32,
                                             matmul_dtype=jnp.bfloat16)
    out_bf16 = jax.block_until_ready(
        basic_block(x.astype(jnp.bfloat16), *params_bf16, pre_out=None))
    assert jnp.allclose(out_bf16, ref, atol=5e-2, rtol=5e-2), "mismatch vs reference (bf16 path)"

    print("KERNEL_OK")
</pallas_src>

<mosaic_0001>
module attributes {stable_mosaic.version = 11 : i64} {
  func.func @_bb_kernel_shared(%arg0: i32, %arg1: memref<8x32xf32, #tpu.memory_space<vmem>>, %arg2: memref<32x32xf32, #tpu.memory_space<vmem>>, %arg3: memref<1x32xf32, #tpu.memory_space<vmem>>, %arg4: memref<32x32xf32, #tpu.memory_space<vmem>>, %arg5: memref<1x32xf32, #tpu.memory_space<vmem>>, %arg6: memref<8x32xf32, #tpu.memory_space<vmem>>) attributes {dimension_semantics = [#tpu.dimension_semantics<parallel>], iteration_bounds = array<i64: 1>, scalar_prefetch = 0 : i64, scratch_operands = 0 : i64, tpu.core_type = #tpu.core_type<tc>, window_params = [{transform_indices = @transform_0, window_bounds = array<i64: 8, 32>}, {pipeline_mode = #tpu.pipeline_mode<synchronous>, transform_indices = @transform_1, window_bounds = array<i64: 32, 32>}, {pipeline_mode = #tpu.pipeline_mode<synchronous>, transform_indices = @transform_2, window_bounds = array<i64: 1, 32>}, {pipeline_mode = #tpu.pipeline_mode<synchronous>, transform_indices = @transform_3, window_bounds = array<i64: 32, 32>}, {pipeline_mode = #tpu.pipeline_mode<synchronous>, transform_indices = @transform_4, window_bounds = array<i64: 1, 32>}, {transform_indices = @transform_5, window_bounds = array<i64: 8, 32>}]} {
    %c0 = arith.constant 0 : index
    %c0_0 = arith.constant 0 : index
    %0 = vector.load %arg1[%c0, %c0_0] : memref<8x32xf32, #tpu.memory_space<vmem>>, vector<8x32xf32>
    %c0_1 = arith.constant 0 : index
    %c0_2 = arith.constant 0 : index
    %1 = vector.load %arg2[%c0_1, %c0_2] : memref<32x32xf32, #tpu.memory_space<vmem>>, vector<32x32xf32>
    %cst = arith.constant dense<0.000000e+00> : vector<8x32xf32>
    %2 = tpu.matmul %0, %1, %cst {dimension_numbers = #tpu.dot_dimension_numbers<[1], [0], [0], [1], [0, 0, 1, 1], [], []>} : vector<8x32xf32>, vector<32x32xf32>, vector<8x32xf32> -> vector<8x32xf32>
    %c0_3 = arith.constant 0 : index
    %c0_4 = arith.constant 0 : index
    %3 = vector.load %arg3[%c0_3, %c0_4] : memref<1x32xf32, #tpu.memory_space<vmem>>, vector<1x32xf32>
    %4 = vector.broadcast %3 : vector<1x32xf32> to vector<8x32xf32>
    %5 = arith.addf %2, %4 : vector<8x32xf32>
    %c0_5 = arith.constant 0 : index
    %c0_6 = arith.constant 0 : index
    %6 = vector.load %arg4[%c0_5, %c0_6] : memref<32x32xf32, #tpu.memory_space<vmem>>, vector<32x32xf32>
    %cst_7 = arith.constant dense<0.000000e+00> : vector<8x32xf32>
    %7 = tpu.matmul %0, %6, %cst_7 {dimension_numbers = #tpu.dot_dimension_numbers<[1], [0], [0], [1], [0, 0, 1, 1], [], []>} : vector<8x32xf32>, vector<32x32xf32>, vector<8x32xf32> -> vector<8x32xf32>
    %c0_8 = arith.constant 0 : index
    %c0_9 = arith.constant 0 : index
    %8 = vector.load %arg5[%c0_8, %c0_9] : memref<1x32xf32, #tpu.memory_space<vmem>>, vector<1x32xf32>
    %9 = vector.broadcast %8 : vector<1x32xf32> to vector<8x32xf32>
    %10 = arith.addf %7, %9 : vector<8x32xf32>
    %cst_10 = arith.constant 0.000000e+00 : f32
    %11 = vector.broadcast %cst_10 : f32 to vector<8x32xf32>
    %12 = arith.maximumf %5, %11 : vector<8x32xf32>
    %13 = arith.addf %12, %10 : vector<8x32xf32>
    %cst_11 = arith.constant 0.000000e+00 : f32
    %14 = vector.broadcast %cst_11 : f32 to vector<8x32xf32>
    %15 = arith.cmpf oge, %13, %14 : vector<8x32xf32>
    %cst_12 = arith.constant 0.00999999977 : f32
    %16 = vector.broadcast %cst_12 : f32 to vector<8x32xf32>
    %17 = arith.mulf %16, %13 : vector<8x32xf32>
    %18 = arith.select %15, %13, %17 : vector<8x32xi1>, vector<8x32xf32>
    %c0_13 = arith.constant 0 : index
    %c0_14 = arith.constant 0 : index
    %19 = vector.load %arg6[%c0_13, %c0_14] : memref<8x32xf32, #tpu.memory_space<vmem>>, vector<8x32xf32>
    tpu.vector_store %arg6[%c0_13, %c0_14], %18 {strides = array<i32>} : memref<8x32xf32, #tpu.memory_space<vmem>>, vector<8x32xf32>,
    return
  }
  func.func @transform_0(%arg0: i32) -> (i32, i32) {
    %c0_i32 = arith.constant 0 : i32
    %c0_i32_0 = arith.constant 0 : i32
    return %arg0, %c0_i32 : i32, i32
  }
  func.func @transform_1(%arg0: i32) -> (i32, i32) {
    %c0_i32 = arith.constant 0 : i32
    %c0_i32_0 = arith.constant 0 : i32
    %c0_i32_1 = arith.constant 0 : i32
    return %c0_i32, %c0_i32_0 : i32, i32
  }
  func.func @transform_2(%arg0: i32) -> (i32, i32) {
    %c0_i32 = arith.constant 0 : i32
    %c0_i32_0 = arith.constant 0 : i32
    %c0_i32_1 = arith.constant 0 : i32
    return %c0_i32, %c0_i32_0 : i32, i32
  }
  func.func @transform_3(%arg0: i32) -> (i32, i32) {
    %c0_i32 = arith.constant 0 : i32
    %c0_i32_0 = arith.constant 0 : i32
    %c0_i32_1 = arith.constant 0 : i32
    return %c0_i32, %c0_i32_0 : i32, i32
  }
  func.func @transform_4(%arg0: i32) -> (i32, i32) {
    %c0_i32 = arith.constant 0 : i32
    %c0_i32_0 = arith.constant 0 : i32
    %c0_i32_1 = arith.constant 0 : i32
    return %c0_i32, %c0_i32_0 : i32, i32
  }
  func.func @transform_5(%arg0: i32) -> (i32, i32) {
    %c0_i32 = arith.constant 0 : i32
    %c0_i32_0 = arith.constant 0 : i32
    return %arg0, %c0_i32 : i32, i32
  }
}

</mosaic_0001>

<bundles_post_ra>
// kernel: tpu_custom_call.1
= control target key start
LH: loop header
LB: loop body
LE: loop exit
PB: predicated region body
PF: predicated region fallthrough
CT: control target
= control target key end

     0   :  { %10 = vsyncpa [#allocation3], 0  ;;  %s438_s0 = inlined_call_operand.hbm [shape: f32[8,32], index: 0, kind: input, shape index: {}]   ;;  %s439_s1 = inlined_call_operand.hbm [shape: f32[32,32], index: 1, kind: input, shape index: {}]   ;;  %s440_s2 = inlined_call_operand.vmem [shape: f32[1,32], index: 2, kind: input, shape index: {}]   ;;  %s441_s3 = inlined_call_operand.hbm [shape: f32[32,32], index: 3, kind: input, shape index: {}]   ;;  %s442_s4 = inlined_call_operand.vmem [shape: f32[1,32], index: 4, kind: input, shape index: {}]   ;;  %s443_s5 = inlined_call_operand.hbm [shape: f32[8,32], index: 5, kind: output, shape index: {}]  }
   0x1   :  { %11 = vsyncpa [#allocation6], 0 }
   0x2   :  { %12 = vsyncpa [#allocation4], 0  ;;  %s379_s18 = smov [#allocation5]  }
   0x3   :  { %s28_s19 = sshll.u32 %s379_s18, 4  ;;  %s29_s19 = int_to_ptr.vmem [resolvable:$true] %s28_s19 }
   0x4   :  { %s301_s20 = scalar_lea.vmem %s29_s19, 512  ;;  %p306_p1 = scmp.lt.s32.totalorder %s29_s19, %s29_s19 }
   0x5   :  { %p302_p0 = scmp.ne.s32.totalorder %s29_s19, %s301_s20  ;;  %p307_p2 = scmp.lt.s32.totalorder %s301_s20, %s301_s20 }
   0x7   :  { %p308_p3 = por %p307_p2, %p306_p1 }
   0x9   :  { %p309_p4 = pnand %p308_p3, %p302_p0 }
   0xb   :  { %312 = shalt.err (!%p309_p4)
}
   0xc   :  { %s380_s21 = smov 128   ;;  %s381_s22 = smov 8  }
   0xd   :  { %34 = dma.hbm_to_vmem [thread:$0]  %s439_s1, 512, %s29_s19, [#allocation6], %s380_s21, %s380_s21, %s381_s22  }
   0xe   :  { %s382_s25 = smov [#allocation2]   ;;  %s383_s27 = smov [#allocation7]  }
   0xf   :  { %s19_s26 = sshll.u32 %s382_s25, 4  ;;  %s42_s28 = sshll.u32 %s383_s27, 4  ;;  %s20_s26 = int_to_ptr.vmem [resolvable:$true] %s19_s26  ;;  %s43_s28 = int_to_ptr.vmem [resolvable:$true] %s42_s28 }
  0x10   :  { %s321_s29 = scalar_lea.vmem %s20_s26, 128  ;;  %p326_p6 = scmp.lt.s32.totalorder %s20_s26, %s20_s26 }
  0x11   :  { %p322_p5 = scmp.ne.s32.totalorder %s20_s26, %s321_s29  ;;  %p327_p7 = scmp.lt.s32.totalorder %s321_s29, %s321_s29 }
  0x13   :  { %p328_p8 = por %p327_p7, %p326_p6 }
  0x15   :  { %p329_p9 = pnand %p328_p8, %p322_p5 }
  0x17   :  { %332 = shalt.err (!%p329_p9)
}
  0x18   :  { %22 = dma.hbm_to_vmem [thread:$0]  %s438_s0, 128, %s20_s26, [#allocation3]  }
  0x19   :  { %s341_s7 = scalar_lea.vmem %s43_s28, 512  ;;  %p346_p11 = scmp.lt.s32.totalorder %s43_s28, %s43_s28 }
  0x1a   :  { %p342_p10 = scmp.ne.s32.totalorder %s43_s28, %s341_s7  ;;  %p347_p12 = scmp.lt.s32.totalorder %s341_s7, %s341_s7 }
  0x1c   :  { %p348_p13 = por %p347_p12, %p346_p11 }
  0x1e   :  { %p349_p0 = pnand %p348_p13, %p342_p10 }
  0x20   :  { %352 = shalt.err (!%p349_p0)
}
  0x21   :  { %48 = dma.hbm_to_vmem [thread:$0]  %s441_s3, 512, %s43_s28, [#allocation6], %s380_s21, %s380_s21, %s381_s22  }
  0x22   :  { %373 = dma.done.wait [#allocation3], 128  }
  0x23   :  { %374 = vsyncadd [#allocation3], 4294967168 }
  0x24   :  { %375 = dma.done.wait [#allocation6], 1024  }
  0x25   :  { %376 = vsyncadd [#allocation6], 4294966272  ;;  %v384_v0 = vmov 0.0   ;;  %vm385_vm0 = vmmov 0   ;;  %v64_v1 = vld [vmem:[#allocation5 + $0x18] sm:$0xff]  ;;  %v63_v3 = vld [vmem:[#allocation5 + $0x10] sm:$0xff] }
  0x26   :  { %263 = vmatprep.subr.mxu0 %v384_v0  ;;  %274 = vmatprep.subr.mxu1 %v384_v0  ;;  %v149_v2 = vld [vmem:[#allocation7 + $0x18] sm:$0xff]  ;;  %v148_v4 = vld [vmem:[#allocation7 + $0x10] sm:$0xff]  ;;  %v62_v5 = vld [vmem:[#allocation5 + $0x8] sm:$0xff]  ;;  %vm72_vm1 = vcmask 261120   ;;  %s386_s11 = smov [#allocation8]  }
  0x27   :  { %271 = vmatprep.mubr.msk.f32.mxu0 %vm385_vm0, %v384_v0  ;;  %282 = vmatprep.mubr.msk.f32.mxu1 %vm385_vm0, %v384_v0  ;;  %v147_v6 = vld [vmem:[#allocation7 + $0x8] sm:$0xff]  ;;  %v61_v7 = vld [vmem:[#allocation5] sm:$0xff]  ;;  %v60_v9 = vld [vmem:[#allocation2] sm:$0xff]  ;;  %s239_s12 = sshll.u32 %s386_s11, 4  ;;  %s240_s12 = int_to_ptr.vmem [resolvable:$true] %s239_s12 }
  0x28   :  { %264 = vmatpush3.msra.mxu0 %v64_v1  ;;  %275 = vmatpush3.msra.mxu1 %v149_v2  ;;  %v146_v8 = vld [vmem:[#allocation7] sm:$0xff]  ;;  %v249_v10 = vld [vmem:[%s440_s2] ss:$0 sm:$0xff]  ;;  %s353_s2 = scalar_lea.vmem %s240_s12, 128  ;;  %p358_p2 = scmp.lt.s32.totalorder %s240_s12, %s240_s12 }
  0x29   :  { %265 = vmatprep.subr.mxu0 %v384_v0  ;;  %276 = vmatprep.subr.mxu1 %v384_v0  ;;  %v251_v11 = vld [vmem:[%s442_s4] ss:$0 sm:$0xff]  ;;  %p354_p1 = scmp.ne.s32.totalorder %s240_s12, %s353_s2  ;;  %p359_p3 = scmp.lt.s32.totalorder %s353_s2, %s353_s2 }
  0x2a   :  { %266 = vmatpush3.msra.mxu0 %v63_v3  ;;  %277 = vmatpush3.msra.mxu1 %v148_v4 }
  0x2b   :  { %267 = vmatprep.subr.mxu0 %v384_v0  ;;  %278 = vmatprep.subr.mxu1 %v384_v0  ;;  %p360_p4 = por %p359_p3, %p358_p2 }
  0x2c   :  { %268 = vmatpush3.msra.mxu0 %v62_v5  ;;  %279 = vmatpush3.msra.mxu1 %v147_v6 }
  0x2d   :  { %269 = vmatprep.subr.mxu0 %v384_v0  ;;  %280 = vmatprep.subr.mxu1 %v384_v0  ;;  %p361_p5 = pnand %p360_p4, %p354_p1 }
  0x2e   :  { %270 = vmatpush3.msra.mxu0 %v61_v7  ;;  %281 = vmatpush3.msra.mxu1 %v146_v8 }
  0x2f   :  { %272 = vmatmul.mubr.msk.f32.vlgmr.msra.gmra.mxu0 %vm72_vm1, %v60_v9  ;;  %283 = vmatmul.mubr.msk.f32.vlgmr.msra.gmra.mxu1 %vm72_vm1, %v60_v9 }
  0xef   :  { %v142_v12 = vpop.f32.mrf.mxu0  ;;  %v223_v13 = vpop.f32.mrf.mxu1 }
  0xf0   :  { %v143_v14 = vadd.f32 %v249_v10, %v142_v12  ;;  %v224_v15 = vadd.f32 %v251_v11, %v223_v13 }
  0xf1   :  { %v273_v16 = vpop.f32.mrf.mxu0  ;;  %v284_v17 = vpop.f32.mrf.mxu1 }
  0xf2   :  { %v227_v18 = vmax.f32 %v143_v14, 0.0 }
  0xf4   :  { %v228_v19 = vadd.f32 %v227_v18, %v224_v15 }
  0xf6   :  { %v230_v20 = vmul.f32 0.01, %v228_v19  ;;  %vm229_vm2 = vcmp.ge.f32.partialorder %v228_v19, 0.0 }
  0xf8   :  { %v231_v21 = vsel %vm229_vm2, %v228_v19, %v230_v20 }
  0xf9   :  { %232 = vst.msk [vmem:[#allocation8] sm:$0xff] %vm72_vm1, %v231_v21 }
  0xfa   :  { %364 = shalt.err (!%p361_p5)
}
  0xfb   :  { %242 = dma.vmem_to_hbm [thread:$0]  %s240_s12, 128, %s443_s5, [#allocation4]  }
  0xfc   :  { %377 = dma.done.wait [#allocation4], 128  }
  0xfd   :  { %378 = vsyncadd [#allocation4], 4294967168 }
  0xfe   :  { %246 = vsyncpa [#allocation3], 1 }
  0xff   :  { %247 = vsyncpa [#allocation6], 1 }
 0x100   :  { %248 = vsyncpa [#allocation4], 1 }

</bundles_post_ra>
